<compile_context>
chip_gen: v5e
topology: v5e:2x2
jax: 0.10.0
libtpu: 0.0.40
codegen_flags: <defaults>
</compile_context>

<pallas_src>
from itertools import combinations_with_replacement

import numpy as np
import jax
import jax.numpy as jnp
from jax.experimental import pallas as pl
from jax.experimental.pallas import tpu as pltpu


# ----------------------------------------------------------------------------
# Parameter / Hamiltonian construction (setup-time glue, mirrors PyTorch helpers)
# ----------------------------------------------------------------------------
def single_photon_hamiltonian_bs(modes, m1, m2):
    """SinglePhotonHamiltonianBS: antisymmetric m x m generator of a beamsplitter."""
    H = np.zeros((modes, modes), dtype=np.float64)
    H[m1, m2] = -1.0
    H[m2, m1] = +1.0
    return H


def fock_basis(n, m):
    """All occupation-number tuples (n photons in m modes)."""
    basis = []
    for comb in combinations_with_replacement(range(m), n):
        occ = [0] * m
        for c in comb:
            occ[c] += 1
        basis.append(tuple(occ))
    return basis


def photon_hamiltonian(hs, photons):
    """Lift a single-photon Hamiltonian hs (m x m) to the n-photon Fock space:
       H_Fock[p, q] = <p| sum_{jk} hs[j,k] a_j^dag a_k |q>."""
    m = hs.shape[0]
    basis = fock_basis(photons, m)
    idx = {s: i for i, s in enumerate(basis)}
    D = len(basis)
    H = np.zeros((D, D), dtype=np.float64)
    for q_i, q in enumerate(basis):
        for j in range(m):
            for k in range(m):
                h_jk = hs[j, k]
                if h_jk == 0.0:
                    continue
                if j == k:
                    H[q_i, q_i] += h_jk * q[j]
                else:
                    if q[k] == 0:
                        continue
                    p = list(q)
                    p[k] -= 1
                    p[j] += 1
                    p_i = idx[tuple(p)]
                    H[p_i, q_i] += h_jk * np.sqrt(q[k] * (q[j] + 1))
    return H


def hamiltonian_bs(photons, modes, m1, m2):
    """HamiltonianBS: lifted beamsplitter generator, cast to float32 (as in PyTorch)."""
    HS = single_photon_hamiltonian_bs(modes, m1, m2)
    return photon_hamiltonian(HS, photons).astype(np.float32)


# ----------------------------------------------------------------------------
# Pallas kernel: out = U_pad @ x_pad  (single MXU matmul per batch tile)
# ----------------------------------------------------------------------------
def bs_fock_unitary_kernel(u_ref, x_ref, o_ref):
    # (Dr, Dk) x (Dk, bn) -> (Dr, bn); f32 MXU accumulation, lane-dense direct store.
    o_ref[...] = jnp.dot(u_ref[...], x_ref[...],
                         preferred_element_type=jnp.float32).astype(o_ref.dtype)


def _round_up(x, m):
    return ((x + m - 1) // m) * m


def _pick_bn(Bp, block_b):
    """Pick the batch tile: divides Bp exactly, <= block_b, and gives >= 2 grid steps
    whenever Bp > 128 (so both v7x TensorCores get work on the 'parallel' axis)."""
    block_b = max(block_b, 128)
    if Bp <= 128:
        return Bp
    for cand in (512, 256, 128):
        if cand <= block_b and Bp % cand == 0 and Bp // cand >= 2:
            return cand
    return 128


def _bs_fock_apply(U_padded, matrix, *, d, block_b):
    """Forward of BS_Fock_unitary: U (d, d) @ matrix (d, B) (or (d,) vector),
    computed as U_padded (Dr, Dk) @ x_padded (Dk, Bp) with exact zero-padding."""
    squeeze = matrix.ndim == 1
    if squeeze:
        matrix = matrix[:, None]
    matrix = matrix.astype(jnp.float32)
    _, B = matrix.shape
    Dr, Dk = U_padded.shape

    Bp = _round_up(B, 128)
    bn = _pick_bn(Bp, block_b)

    # Pad x rows to the 128-aligned contracting dim and columns to a lane multiple.
    # Exact: padded rows of x are zero, so padded columns of U never contribute.
    x_p = jnp.zeros((Dk, Bp), jnp.float32).at[:d, :B].set(matrix)

    # VMEM working set: U single-buffered + double-buffered x / out tiles (+ slack).
    work_bytes = 4 * (Dr * Dk + 2 * Dk * bn + 2 * Dr * bn)
    vmem_limit = int(min(64 << 20, max(4 << 20, 2 * work_bytes)))

    out_p = pl.pallas_call(
        bs_fock_unitary_kernel,
        out_shape=jax.ShapeDtypeStruct((Dr, Bp), jnp.float32),
        grid_spec=pltpu.PrefetchScalarGridSpec(
            num_scalar_prefetch=0,
            grid=(Bp // bn,),                                   # batch tiles only
            in_specs=[
                # U: resident, constant index_map -> single buffer is enough.
                pl.BlockSpec((Dr, Dk), lambda j: (0, 0),
                             pipeline_mode=pl.Buffered(1)),
                # x: batch tile j on the lane axis.
                pl.BlockSpec((Dk, bn), lambda j: (0, j)),
            ],
            out_specs=pl.BlockSpec((Dr, bn), lambda j: (0, j)),  # lane-dense output tile
        ),
        compiler_params=pltpu.CompilerParams(
            dimension_semantics=("parallel",),                   # batch axis is parallel
            vmem_limit_bytes=vmem_limit,
            allow_input_fusion=[False, True],                    # fuse x zero-pad into fetch
        ),
        cost_estimate=pl.CostEstimate(
            flops=2 * Dr * Dk * Bp,
            transcendentals=0,
            bytes_accessed=4 * (Dr * Dk + Dk * Bp + Dr * Bp),
        ),
    )(U_padded, x_p)

    out = out_p[:d, :B]
    if squeeze:
        out = out[:, 0]
    return out


class BSFockUnitary:
    """Pallas/JAX equivalent of the PyTorch BS_Fock_unitary module."""

    def __init__(self, n, m, m1, m2, angle, block_b=256):
        H = jnp.asarray(hamiltonian_bs(n, m, m1, m2), dtype=jnp.float32)
        U = jax.scipy.linalg.expm(-1.0 * H * angle).astype(jnp.float32)
        self.unitary = U                                   # exact (D, D) unitary
        d = int(U.shape[0])
        self.d = d
        dr = _round_up(d, 8)                               # sublane-aligned rows
        dk = _round_up(d, 128)                             # lane-aligned contracting dim
        # Padded U built ONCE at setup (hoisted out of the hot path).
        self.unitary_padded = jnp.zeros((dr, dk), jnp.float32).at[:d, :d].set(U)
        self._apply = jax.jit(
            lambda u_p, x: _bs_fock_apply(u_p, x, d=d, block_b=block_b))

    def __call__(self, matrix):
        return self._apply(self.unitary_padded, matrix)


# ----------------------------------------------------------------------------
# Example / self-test
# ----------------------------------------------------------------------------
if __name__ == "__main__":
    # n=2 photons, m=4 modes -> Fock dim D = C(5, 2) = 10; beamsplitter on modes (0, 1)
    n_photons = 2
    n_modes = 4
    m1, m2 = 0, 1

    key = jax.random.PRNGKey(0)
    k_angle, k_state = jax.random.split(key)
    angle = jax.random.uniform(k_angle, (), dtype=jnp.float32)   # ~ torch.rand(())

    gate = BSFockUnitary(n_photons, n_modes, m1, m2, angle)
    D = gate.d                                                   # 10
    B = 4                                                        # small batch of columns
    matrix = jax.random.normal(k_state, (D, B), dtype=jnp.float32)

    # Matrix input
    out = jax.block_until_ready(gate(matrix))
    ref = gate.unitary @ matrix
    np.testing.assert_allclose(np.asarray(out), np.asarray(ref), rtol=1e-4, atol=1e-5)

    # Vector (single Fock state) input
    vec = matrix[:, 0]
    out_v = jax.block_until_ready(gate(vec))
    np.testing.assert_allclose(np.asarray(out_v), np.asarray(gate.unitary @ vec),
                               rtol=1e-4, atol=1e-5)

    print("KERNEL_OK")
</pallas_src>

<mosaic_0001>
module attributes {stable_mosaic.version = 11 : i64} {
  func.func @bs_fock_unitary_kernel(%arg0: i32, %arg1: memref<16x128xf32, #tpu.memory_space<vmem>>, %arg2: memref<128x128xf32, #tpu.memory_space<vmem>>, %arg3: memref<16x128xf32, #tpu.memory_space<vmem>>) attributes {dimension_semantics = [#tpu.dimension_semantics<parallel>], iteration_bounds = array<i64: 1>, scalar_prefetch = 0 : i64, scratch_operands = 0 : i64, tpu.core_type = #tpu.core_type<tc>, window_params = [{pipeline_mode = #tpu.pipeline_mode<synchronous>, transform_indices = @transform_0, window_bounds = array<i64: 16, 128>}, {transform_indices = @transform_1, window_bounds = array<i64: 128, 128>}, {transform_indices = @transform_2, window_bounds = array<i64: 16, 128>}]} {
    %c0 = arith.constant 0 : index
    %c0_0 = arith.constant 0 : index
    %0 = vector.load %arg1[%c0, %c0_0] : memref<16x128xf32, #tpu.memory_space<vmem>>, vector<16x128xf32>
    %c0_1 = arith.constant 0 : index
    %c0_2 = arith.constant 0 : index
    %1 = vector.load %arg2[%c0_1, %c0_2] : memref<128x128xf32, #tpu.memory_space<vmem>>, vector<128x128xf32>
    %cst = arith.constant dense<0.000000e+00> : vector<16x128xf32>
    %2 = tpu.matmul %0, %1, %cst {dimension_numbers = #tpu.dot_dimension_numbers<[1], [0], [0], [1], [0, 0, 1, 1], [], []>} : vector<16x128xf32>, vector<128x128xf32>, vector<16x128xf32> -> vector<16x128xf32>
    %c0_3 = arith.constant 0 : index
    %c0_4 = arith.constant 0 : index
    %3 = vector.load %arg3[%c0_3, %c0_4] : memref<16x128xf32, #tpu.memory_space<vmem>>, vector<16x128xf32>
    tpu.vector_store %arg3[%c0_3, %c0_4], %2 {strides = array<i32>} : memref<16x128xf32, #tpu.memory_space<vmem>>, vector<16x128xf32>,
    return
  }
  func.func @transform_0(%arg0: i32) -> (i32, i32) {
    %c0_i32 = arith.constant 0 : i32
    %c0_i32_0 = arith.constant 0 : i32
    %c0_i32_1 = arith.constant 0 : i32
    return %c0_i32, %c0_i32_0 : i32, i32
  }
  func.func @transform_1(%arg0: i32) -> (i32, i32) {
    %c0_i32 = arith.constant 0 : i32
    %c0_i32_0 = arith.constant 0 : i32
    return %c0_i32, %arg0 : i32, i32
  }
  func.func @transform_2(%arg0: i32) -> (i32, i32) {
    %c0_i32 = arith.constant 0 : i32
    %c0_i32_0 = arith.constant 0 : i32
    return %c0_i32, %arg0 : i32, i32
  }
}

</mosaic_0001>

<bundles_post_ra>
// kernel: _lambda_.2
= control target key start
LH: loop header
LB: loop body
LE: loop exit
PB: predicated region body
PF: predicated region fallthrough
CT: control target
= control target key end

     0   :  { %v19_v1 = vlaneseq  ;;  %s204_s0 = inlined_call_operand.vmem [shape: f32[16,128], index: 0, kind: input, shape index: {}]   ;;  %s205_s1 = inlined_call_operand.vmem [shape: f32[10,4], index: 1, kind: input, shape index: {}]   ;;  %s206_s2 = inlined_call_operand.<no memory space> [shape: f32[], index: 2, kind: input, shape index: {}]   ;;  %s207_s3 = inlined_call_operand.vmem [shape: f32[16,128], index: 3, kind: output, shape index: {}]  }
   0x1   :  { %v8_v0 = vstv %s206_s2  ;;  %v146_v5 = vld [vmem:[%s205_s1 + $0x8] sm:$0xff]  ;;  %v13_v7 = vld [vmem:[%s205_s1] sm:$0xff] }
   0x2   :  { %117 = vmatpush.msra.mxu0 %v8_v0  ;;  %147 = vmatpush.msra.mxu1 %v8_v0  ;;  %v30_v2 = vshrl.u32 %v19_v1, 7  ;;  %v20_v4 = vand.u32 127, %v19_v1  ;;  %v99_v10 = vld [vmem:[%s204_s0] sm:$0xff]  ;;  %v100_v11 = vld [vmem:[%s204_s0 + $0x8] sm:$0xff] }
   0x4   :  { %118 = vmatpush.msra.mxu0 %v8_v0  ;;  %148 = vmatpush.msra.mxu1 %v8_v0  ;;  %v31_v3 = vadd.s32 8, %v30_v2  ;;  %vm22_vm1 = vcmp.lt.s32.totalorder %v20_v4, 4 }
   0x5   :  { %v23_v9 = vsel %vm22_vm1, %v13_v7, %v8_v0 }
   0x6   :  { %119 = vmatpush.msra.mxu0 %v8_v0  ;;  %149 = vmatpush.msra.mxu1 %v8_v0  ;;  %vm32_vm0 = vcmp.lt.s32.totalorder %v31_v3, 10 }
   0x7   :  { %v33_v6 = vsel %vm32_vm0, %v146_v5, %v8_v0 }
   0x8   :  { %120 = vmatpush.msra.mxu0 %v8_v0  ;;  %150 = vmatpush.msra.mxu1 %v8_v0  ;;  %v38_v8 = vsel %vm22_vm1, %v33_v6, %v8_v0 }
   0xa   :  { %121 = vmatpush.msra.mxu0 %v8_v0  ;;  %151 = vmatpush.msra.mxu1 %v8_v0 }
   0xc   :  { %122 = vmatpush.msra.mxu0 %v8_v0  ;;  %152 = vmatpush.msra.mxu1 %v8_v0 }
   0xe   :  { %123 = vmatpush.msra.mxu0 %v8_v0  ;;  %153 = vmatpush.msra.mxu1 %v8_v0 }
  0x10   :  { %124 = vmatpush.msra.mxu0 %v8_v0  ;;  %154 = vmatpush.msra.mxu1 %v8_v0 }
  0x12   :  { %125 = vmatpush.msra.mxu0 %v8_v0  ;;  %155 = vmatpush.msra.mxu1 %v8_v0 }
  0x14   :  { %126 = vmatpush.msra.mxu0 %v8_v0  ;;  %156 = vmatpush.msra.mxu1 %v8_v0 }
  0x16   :  { %127 = vmatpush.msra.mxu0 %v8_v0  ;;  %157 = vmatpush.msra.mxu1 %v8_v0 }
  0x18   :  { %128 = vmatpush.msra.mxu0 %v8_v0  ;;  %158 = vmatpush.msra.mxu1 %v8_v0 }
  0x1a   :  { %129 = vmatpush.msra.mxu0 %v8_v0  ;;  %159 = vmatpush.msra.mxu1 %v8_v0 }
  0x1c   :  { %130 = vmatpush.msra.mxu0 %v8_v0  ;;  %160 = vmatpush.msra.mxu1 %v8_v0 }
  0x1e   :  { %131 = vmatpush.msra.mxu0 %v38_v8  ;;  %161 = vmatpush.msra.mxu1 %v38_v8 }
  0x20   :  { %132 = vmatpush.msra.mxu0 %v23_v9  ;;  %162 = vmatpush.msra.mxu1 %v23_v9 }
  0x21   :  { %133 = vmatmul.f32.vlgmr.msra.gmra.mxu0 %v99_v10  ;;  %136 = vmatmul.f32.vlgmr.msra.gmra.mxu1 %v100_v11 }
  0x9e   :  { %v134_v12 = vpop.f32.mrf.mxu0  ;;  %v137_v13 = vpop.f32.mrf.mxu1 }
  0x9f   :  { %140 = vst [vmem:[%s207_s3] sm:$0xff] %v134_v12 }
  0xa0   :  { %141 = vst [vmem:[%s207_s3 + $0x8] sm:$0xff] %v137_v13 }

</bundles_post_ra>
